<compile_context>
chip_gen: v7x
topology: tpu7x:2x2x1
jax: 0.10.0
libtpu: 0.0.40
codegen_flags: <defaults>
</compile_context>

<pallas_src>
import functools

import jax
import jax.numpy as jnp
import numpy as np
from jax.experimental import pallas as pl
from jax.experimental.pallas import tpu as pltpu


def _gcl_kernel(x_ref, adj_ref, mw_ref, bias_ref, o_ref):
    """One block of Bblk batch elements per grid step.

    x_ref    : (Bblk, N, T*C_in)    node features, lanes ordered (t, c)
    adj_ref  : (N*H, N)             dense per-head adjacency (VMEM-resident)
    mw_ref   : (T*C_in, T*C_out)    EMA-mix + fc weight = kron(Mix^T, W^T) (resident)
    bias_ref : (1, T*C_out)         fc bias tiled over T (resident, f32)
    o_ref    : (Bblk, N*H, T*C_out) lane-dense (128-wide) output slab
    """
    bblk, n_nodes, tc = x_ref.shape
    nh = adj_ref.shape[0]
    tco = mw_ref.shape[1]

    # Graph aggregation for all timesteps & all Bblk batches as one batched MXU
    # matmul: (Bblk, N*H, N) @ (Bblk, N, T*C) -> (Bblk, N*H, T*C).
    adj_b = jnp.broadcast_to(adj_ref[...], (bblk, nh, n_nodes))
    agg = jnp.einsum('bmp,bpc->bmc', adj_b, x_ref[...],
                     preferred_element_type=jnp.float32)

    # Temporal EMA + fc folded into one weight; flatten (Bblk, N*H) -> rows so
    # this is a single well-shaped 2-D MXU matmul (leading-dim reshapes = free).
    agg2 = agg.reshape(bblk * nh, tc).astype(mw_ref.dtype)
    out = jnp.dot(agg2, mw_ref[...], preferred_element_type=jnp.float32)
    out = out.reshape(bblk, nh, tco) + bias_ref[...]
    o_ref[...] = jnp.maximum(out, 0.0)


def init_gcl_params(nearest_nodes, nearest_dist, fc_weight, fc_bias, *,
                    n_heads, seq_len, sigma=6.0, alpha=0.2,
                    compute_dtype=jnp.float32):
    """Data-independent parameter glue -- build once at init, not per forward."""
    N, K1 = nearest_nodes.shape
    T = seq_len
    H = n_heads
    C = fc_weight.shape[1]
    n_out = fc_weight.shape[0]

    # Per-head gaussian kernel weights -> dense adjacency (N*H, N).  The torch
    # pad node (index -1 -> zero features) contributes nothing, so its column
    # is dropped instead of padding x.  Keep exp / thresholds / inf handling in
    # f32 even when compute_dtype is bf16.
    lam = jnp.arange(1, H + 1, dtype=jnp.float32) / H                        # (H,)
    nd = nearest_dist.reshape(-1).astype(jnp.float32)                        # (N*K1,)
    nnf = nearest_nodes.reshape(-1)                                          # (N*K1,)
    w = jnp.exp(-(nd[:, None] ** 2) * lam[None, :] / (sigma ** 2))           # (N*K1, H)
    w = jnp.where(nnf[:, None] == -1, 0.0, w)
    w = jnp.where(w < 1e-8, 0.0, w)
    nn_c = jnp.where(nnf < 0, 0, nnf).reshape(N, K1)        # -1 entries have weight 0
    onehot = (nn_c[:, :, None] == jnp.arange(N)[None, None, :]).astype(jnp.float32)
    adj = jnp.einsum('nkh,nkm->nhm', w.reshape(N, K1, H), onehot).reshape(N * H, N)

    # Temporal EMA mixing matrix (rows sum to 1): agg_new[t] = Mix[t,t'] agg_old[t'].
    mix = (1.0 - alpha) * jnp.eye(T, dtype=jnp.float32) \
        + alpha * jnp.eye(T, k=-1, dtype=jnp.float32)
    mix = mix.at[0, 0].set(1.0)                                              # t=0 untouched
    wt = fc_weight.T.astype(jnp.float32)                                     # (C, n_out)
    # MW[(t1,c),(t,o)] = Mix[t,t1] * W^T[c,o]  (batch-independent).
    mw = jnp.kron(mix.T, wt)                                                 # (T*C, T*n_out)
    bias_row = jnp.tile(fc_bias.astype(jnp.float32), T).reshape(1, T * n_out)

    return (adj.astype(compute_dtype), mw.astype(compute_dtype), bias_row)


def graph_convolution_layer(x, params, *, n_heads, block_b=8):
    """Forward pass.  `params` comes from init_gcl_params (cached across calls)."""
    B, T, N, C = x.shape
    adj, mw, bias_row = params
    H = n_heads
    n_out = mw.shape[1] // T
    assert adj.shape == (N * H, N)

    # Batch blocking: amortize per-grid-step overhead, but keep >= 2 parallel
    # grid blocks whenever B >= 2 so both v7x TensorCores are busy.
    bblk = max(1, min(block_b, B))
    if B >= 2:
        bblk = min(bblk, max(1, B // 2))
    n_blk = pl.cdiv(B, bblk)
    b_pad = n_blk * bblk

    # Input relayout: (B,T,N,C) -> (B, N, T*C), lanes ordered (t, c).
    # TODO(synk): fold into the kernel (einshape on the idle XLU) at prod sizes.
    x3 = jnp.transpose(x, (0, 2, 1, 3)).reshape(B, N, T * C).astype(adj.dtype)
    if b_pad != B:
        x3 = jnp.concatenate(
            [x3, jnp.zeros((b_pad - B, N, T * C), x3.dtype)], axis=0)

    out_flat = pl.pallas_call(
        _gcl_kernel,
        out_shape=jax.ShapeDtypeStruct((b_pad, N * H, T * n_out), jnp.float32),
        grid=(n_blk,),
        in_specs=[
            pl.BlockSpec((bblk, N, T * C), lambda g: (g, 0, 0)),
            pl.BlockSpec((N * H, N), lambda g: (0, 0)),            # resident
            pl.BlockSpec((T * C, T * n_out), lambda g: (0, 0)),    # resident
            pl.BlockSpec((1, T * n_out), lambda g: (0, 0)),        # resident
        ],
        out_specs=pl.BlockSpec((bblk, N * H, T * n_out), lambda g: (g, 0, 0)),
        compiler_params=pltpu.CompilerParams(
            dimension_semantics=("parallel",)),
    )(x3, adj, mw, bias_row)

    # (b_pad, N*H, T*n_out) -> (B, T, N, H, n_out).
    # TODO(synk): this transpose is an HBM copy of the output; at prod sizes
    #   have downstream consume the flat slab or emit per-t slabs in-kernel.
    out = out_flat[:B].reshape(B, N, H, T, n_out)
    return jnp.transpose(out, (0, 3, 1, 2, 4))


def reference_forward(x, nearest_nodes, nearest_dist, fc_weight, fc_bias,
                      n_heads, sigma=6.0, alpha=0.2):
    """Pure-JAX transcription of the PyTorch forward (use_dist_conv=False)."""
    B, T, N, C = x.shape
    K1 = nearest_nodes.shape[1]
    pad_x = jnp.concatenate([x, jnp.zeros_like(x[:, :, :1])], axis=2)
    lam = jnp.arange(1, n_heads + 1, dtype=jnp.float32) / n_heads
    nd = nearest_dist.reshape(-1)
    nnf = nearest_nodes.reshape(-1)
    w = jnp.exp(-(nd[:, None] ** 2) * lam / sigma ** 2)
    w = jnp.where(nnf[:, None] == -1, 0.0, w)
    w = jnp.where(w < 1e-8, 0.0, w)
    nn_c = jnp.where(nnf < 0, N, nnf)            # torch's -1 index hits the zero pad node
    gathered = pad_x[:, :, nn_c, :]              # (B, T, N*K1, C)
    agg = gathered[:, :, :, None, :] * w[None, None, :, :, None]
    agg = agg.reshape(B, T, N, K1, n_heads, C).sum(3)
    agg = agg.at[:, 1:].set((1 - alpha) * agg[:, 1:] + alpha * agg[:, :-1])
    out = jnp.einsum('btnhc,oc->btnho', agg, fc_weight) + fc_bias
    return jnp.maximum(out, 0.0)


if __name__ == "__main__":
    key = jax.random.PRNGKey(0)
    B, T, N, C_in, C_out, H, K = 2, 8, 16, 8, 16, 4, 3
    k1, k2, k3, k4, k5 = jax.random.split(key, 5)

    x = jax.random.normal(k1, (B, T, N, C_in), dtype=jnp.float32)

    # nearest_nodes: (N, K+1) -- self node first, then K random neighbors,
    # with a few "-1" (missing) entries; nearest_dist: (N, K+1), inf where missing.
    neigh = jax.random.randint(k2, (N, K), 0, N)
    nearest_nodes = jnp.concatenate(
        [jnp.arange(N)[:, None], neigh], axis=1).astype(jnp.int32)
    miss_mask = jax.random.bernoulli(k3, 0.2, (N, K))
    nearest_nodes = nearest_nodes.at[:, 1:].set(
        jnp.where(miss_mask, -1, nearest_nodes[:, 1:]))

    dist = jax.random.uniform(k4, (N, K), minval=0.5, maxval=5.0)
    nearest_dist = jnp.concatenate(
        [jnp.zeros((N, 1)), dist], axis=1).astype(jnp.float32)
    nearest_dist = nearest_dist.at[:, 1:].set(
        jnp.where(miss_mask, jnp.inf, nearest_dist[:, 1:]))

    # Deterministic fc = nn.Linear(n_in, n_out) parameters.
    fc_weight = jax.random.normal(k5, (C_out, C_in), dtype=jnp.float32) * 0.1
    fc_bias = jnp.arange(C_out, dtype=jnp.float32) * 0.01

    # Parameter glue is hoisted out of the forward path (init-time, cached).
    params = init_gcl_params(nearest_nodes, nearest_dist, fc_weight, fc_bias,
                             n_heads=H, seq_len=T, sigma=6.0, alpha=0.2,
                             compute_dtype=jnp.float32)

    fwd = jax.jit(functools.partial(graph_convolution_layer, n_heads=H))
    out = fwd(x, params)
    out = jax.block_until_ready(out)

    ref = reference_forward(x, nearest_nodes, nearest_dist,
                            fc_weight, fc_bias, n_heads=H)
    assert out.shape == (B, T, N, H, C_out)
    np.testing.assert_allclose(np.asarray(out), np.asarray(ref),
                               rtol=1e-5, atol=1e-5)
    print("KERNEL_OK")
</pallas_src>

<mosaic_0001>
module attributes {stable_mosaic.version = 11 : i64} {
  func.func @_gcl_kernel(%arg0: i32, %arg1: memref<1x16x64xf32, #tpu.memory_space<vmem>>, %arg2: memref<64x16xf32, #tpu.memory_space<vmem>>, %arg3: memref<64x128xf32, #tpu.memory_space<vmem>>, %arg4: memref<1x128xf32, #tpu.memory_space<vmem>>, %arg5: memref<1x64x128xf32, #tpu.memory_space<vmem>>) attributes {dimension_semantics = [#tpu.dimension_semantics<parallel>], iteration_bounds = array<i64: 2>, scalar_prefetch = 0 : i64, scratch_operands = 0 : i64, tpu.core_type = #tpu.core_type<tc>, window_params = [{transform_indices = @transform_0, window_bounds = array<i64: 1, 16, 64>}, {pipeline_mode = #tpu.pipeline_mode<synchronous>, transform_indices = @transform_1, window_bounds = array<i64: 64, 16>}, {pipeline_mode = #tpu.pipeline_mode<synchronous>, transform_indices = @transform_2, window_bounds = array<i64: 64, 128>}, {pipeline_mode = #tpu.pipeline_mode<synchronous>, transform_indices = @transform_3, window_bounds = array<i64: 1, 128>}, {transform_indices = @transform_4, window_bounds = array<i64: 1, 64, 128>}]} {
    %c0 = arith.constant 0 : index
    %c0_0 = arith.constant 0 : index
    %0 = vector.load %arg2[%c0, %c0_0] : memref<64x16xf32, #tpu.memory_space<vmem>>, vector<64x16xf32>
    %1 = vector.shape_cast %0 : vector<64x16xf32> to vector<1x64x16xf32>
    %c0_1 = arith.constant 0 : index
    %c0_2 = arith.constant 0 : index
    %c0_3 = arith.constant 0 : index
    %2 = vector.load %arg1[%c0_1, %c0_2, %c0_3] : memref<1x16x64xf32, #tpu.memory_space<vmem>>, vector<1x16x64xf32>
    "tpu.trace_start"() <{level = 10 : i32, message = "bmp,bpc->bmc"}> : () -> ()
    %cst = arith.constant dense<0.000000e+00> : vector<1x64x64xf32>
    %3 = tpu.matmul %1, %2, %cst {dimension_numbers = #tpu.dot_dimension_numbers<[2], [1], [1], [2], [0, 0, 0, 1, 1, 2], [0], [0]>} : vector<1x64x16xf32>, vector<1x16x64xf32>, vector<1x64x64xf32> -> vector<1x64x64xf32>
    "tpu.trace_stop"() : () -> ()
    %4 = vector.shape_cast %3 : vector<1x64x64xf32> to vector<64x64xf32>
    %c0_4 = arith.constant 0 : index
    %c0_5 = arith.constant 0 : index
    %5 = vector.load %arg3[%c0_4, %c0_5] : memref<64x128xf32, #tpu.memory_space<vmem>>, vector<64x128xf32>
    %cst_6 = arith.constant dense<0.000000e+00> : vector<64x128xf32>
    %6 = tpu.matmul %4, %5, %cst_6 {dimension_numbers = #tpu.dot_dimension_numbers<[1], [0], [0], [1], [0, 0, 1, 1], [], []>} : vector<64x64xf32>, vector<64x128xf32>, vector<64x128xf32> -> vector<64x128xf32>
    %7 = vector.shape_cast %6 : vector<64x128xf32> to vector<1x64x128xf32>
    %c0_7 = arith.constant 0 : index
    %c0_8 = arith.constant 0 : index
    %8 = vector.load %arg4[%c0_7, %c0_8] : memref<1x128xf32, #tpu.memory_space<vmem>>, vector<1x128xf32>
    %9 = vector.shape_cast %8 : vector<1x128xf32> to vector<1x1x128xf32>
    %10 = vector.broadcast %9 : vector<1x1x128xf32> to vector<1x64x128xf32>
    %11 = arith.addf %7, %10 : vector<1x64x128xf32>
    %cst_9 = arith.constant 0.000000e+00 : f32
    %12 = vector.broadcast %cst_9 : f32 to vector<1x64x128xf32>
    %13 = arith.maximumf %11, %12 : vector<1x64x128xf32>
    %c0_10 = arith.constant 0 : index
    %c0_11 = arith.constant 0 : index
    %c0_12 = arith.constant 0 : index
    %14 = vector.load %arg5[%c0_10, %c0_11, %c0_12] : memref<1x64x128xf32, #tpu.memory_space<vmem>>, vector<1x64x128xf32>
    tpu.vector_store %arg5[%c0_10, %c0_11, %c0_12], %13 {strides = array<i32>} : memref<1x64x128xf32, #tpu.memory_space<vmem>>, vector<1x64x128xf32>,
    return
  }
  func.func @transform_0(%arg0: i32) -> (i32, i32, i32) {
    %c0_i32 = arith.constant 0 : i32
    %c0_i32_0 = arith.constant 0 : i32
    %c0_i32_1 = arith.constant 0 : i32
    return %arg0, %c0_i32, %c0_i32_0 : i32, i32, i32
  }
  func.func @transform_1(%arg0: i32) -> (i32, i32) {
    %c0_i32 = arith.constant 0 : i32
    %c0_i32_0 = arith.constant 0 : i32
    %c0_i32_1 = arith.constant 0 : i32
    return %c0_i32, %c0_i32_0 : i32, i32
  }
  func.func @transform_2(%arg0: i32) -> (i32, i32) {
    %c0_i32 = arith.constant 0 : i32
    %c0_i32_0 = arith.constant 0 : i32
    %c0_i32_1 = arith.constant 0 : i32
    return %c0_i32, %c0_i32_0 : i32, i32
  }
  func.func @transform_3(%arg0: i32) -> (i32, i32) {
    %c0_i32 = arith.constant 0 : i32
    %c0_i32_0 = arith.constant 0 : i32
    %c0_i32_1 = arith.constant 0 : i32
    return %c0_i32, %c0_i32_0 : i32, i32
  }
  func.func @transform_4(%arg0: i32) -> (i32, i32, i32) {
    %c0_i32 = arith.constant 0 : i32
    %c0_i32_0 = arith.constant 0 : i32
    %c0_i32_1 = arith.constant 0 : i32
    return %arg0, %c0_i32, %c0_i32_0 : i32, i32, i32
  }
}

</mosaic_0001>

<bundles_post_ra>
// kernel: graph_convolution_layer.1
= control target key start
LH: loop header
LB: loop body
LE: loop exit
PB: predicated region body
PF: predicated region fallthrough
CT: control target
= control target key end

     0   :  { %s731_s15 = smov 0   ;;  %s819_s0 = inlined_call_operand.vmem [shape: f32[2,16,64], index: 0, kind: input, shape index: {}]   ;;  %s820_s1 = inlined_call_operand.vmem [shape: f32[64,16], index: 1, kind: input, shape index: {}]   ;;  %s821_s2 = inlined_call_operand.vmem [shape: f32[64,128], index: 2, kind: input, shape index: {}]   ;;  %s822_s3 = inlined_call_operand.vmem [shape: f32[1,128], index: 3, kind: input, shape index: {}]   ;;  %s823_s4 = inlined_call_operand.vmem [shape: f32[2,64,128], index: 4, kind: output, shape index: {}]  }
   0x1 LB: > { %s562_s16 = sadd.s32 4294967295, %s704_s15   ;;  %p566_p0 = scmp.ge.s32.totalorder %s704_s15, 1  ;;  %s704_s15 = sphi %s731_s15, %s14_s15  }
   0x2   : > { %p162_p1 = scmp.lt.s32.totalorder %s704_s15, 3 }
   0x4   : > { %p163_p2 = pnand %p566_p0, %p162_p1 }
   0x5   : > { %p188_p3 = scmp.lt.s32.totalorder (!%p163_p2), %s562_s16, 1  ;;  %v198_v0 = vld [vmem:[%s820_s1] sm:$0xff] (!%p163_p2)  ;;  %vm208_vm0 = vcmask (!%p163_p2), 130048   ;;  %v339_v2 = vld [vmem:[%s821_s2 + $0x8] sm:$0xff] (!%p163_p2)  ;;  %v340_v3 = vld [vmem:[%s821_s2 + $0x10] sm:$0xff] (!%p163_p2)  ;;  %vm346_vm1 = vcmask (!%p163_p2), 523264  }
   0x6   : > { %166 = sbr.rel (%p163_p2) target bundleno = 467 (0x1d3), region = 36  ;;  %622 = vmatprep.mubr.msk.f32.mxu0 (!%p163_p2), %vm208_vm0, %v198_v0  ;;  %v338_v1 = vld [vmem:[%s821_s2] sm:$0xff] (!%p163_p2)  ;;  %v341_v4 = vld [vmem:[%s821_s2 + $0x18] sm:$0xff] (!%p163_p2)  ;;  %v343_v11 = vld [vmem:[%s821_s2 + $0x28] sm:$0xff] (!%p163_p2) }
   0x7   : > { %v666_v5 = vpack.c.bf16 (!%p163_p2), %v339_v2, %v338_v1  ;;  %v670_v8 = vpack.c.bf16 (!%p163_p2), %v341_v4, %v340_v3  ;;  %v342_v10 = vld [vmem:[%s821_s2 + $0x20] sm:$0xff] (!%p163_p2)  ;;  %v199_v12 = vld [vmem:[%s820_s1 + $0x8] sm:$0xff] (!%p163_p2)  ;;  %v200_v14 = vld [vmem:[%s820_s1 + $0x10] sm:$0xff] (!%p163_p2) }
   0x8   : > { %v674_v13 = vpack.c.bf16 (!%p163_p2), %v343_v11, %v342_v10  ;;  %v344_v15 = vld [vmem:[%s821_s2 + $0x30] sm:$0xff] (!%p163_p2)  ;;  %v345_v16 = vld [vmem:[%s821_s2 + $0x38] sm:$0xff] (!%p163_p2)  ;;  %v202_v19 = vld [vmem:[%s820_s1 + $0x20] sm:$0xff] (!%p163_p2) }
   0x9   : > { %682 = vmatprep.subr.bf16.mxu1 (!%p163_p2), %v666_v5  ;;  %v201_v17 = vld [vmem:[%s820_s1 + $0x18] sm:$0xff] (!%p163_p2)  ;;  %v678_v18 = vpack.c.bf16 (!%p163_p2), %v345_v16, %v344_v15  ;;  %v203_v20 = vld [vmem:[%s820_s1 + $0x28] sm:$0xff] (!%p163_p2)  ;;  %v204_v21 = vld [vmem:[%s820_s1 + $0x30] sm:$0xff] (!%p163_p2) }
   0xa   : > { %686 = vmatpush3.bf16.msra.mxu1 (!%p163_p2), %v666_v5  ;;  %v205_v22 = vld [vmem:[%s820_s1 + $0x38] sm:$0xff] (!%p163_p2)  ;;  %v587_v31 = vld [vmem:[%s822_s3] ss:$0 sm:$0xff] (!%p163_p2) }
   0xb   : > { %683 = vmatprep.subr.bf16.mxu1 (!%p163_p2), %v670_v8 }
   0xd   : > { %s825_s16 = smov (!%p188_p3, %s562_s16), 1 }
   0xe   : > { %s590_s27 = sshll.u32 %s825_s16, 4  ;;  %687 = vmatpush3.bf16.msra.mxu1 %v670_v8  ;;  %s591_s5 = sshll.u32 %s825_s16, 6 }
   0xf   : > { %s192_s30 = scalar_lea.vmem %s819_s0, %s590_s27  ;;  %684 = vmatprep.subr.bf16.mxu1 %v674_v13  ;;  %s197_s8 = scalar_lea.vmem %s823_s4, %s591_s5 }
  0x10   : > { %v206_v6 = vld [vmem:[%s192_s30] sm:$0xff]  ;;  %v207_v7 = vld [vmem:[%s192_s30 + $0x8] sm:$0xff] }
  0x11   : > { %v662_v9 = vpack.c.bf16 %v207_v7, %v206_v6 }
  0x12   : > { %688 = vmatpush3.bf16.msra.mxu1 %v674_v13 }
  0x13   : > { %663 = vmatprep.subr.bf16.mxu0 %v662_v9  ;;  %685 = vmatprep.subr.bf16.mxu1 %v678_v18 }
  0x14   : > { %665 = vmatpush3.bf16.msra.mxu0 %v662_v9 }
  0x15   : > { %667 = vmatprep.subr.bf16.mxu0 %v666_v5 }
  0x16   : > { %689 = vmatpush3.bf16.msra.mxu1 %v678_v18 }
  0x17   : > { %623 = vmatmul.mubr.msk.f32.vlgmr.msra.gmra.mrb[0].mxu0 %vm208_vm0, %v199_v12 }
  0x18   : > { %625 = vmatprep.mubr.msk.f32.mxu0 %vm208_vm0, %v200_v14  ;;  %669 = vmatpush3.bf16.msra.mxu0 %v666_v5 }
  0x19   : > { %671 = vmatprep.subr.bf16.mxu0 %v670_v8 }
  0x1b   : > { %626 = vmatmul.mubr.msk.f32.gmra.mrb[2].mxu0 %vm208_vm0, %v201_v17 }
  0x1c   : > { %628 = vmatprep.mubr.msk.f32.mxu0 %vm208_vm0, %v202_v19  ;;  %673 = vmatpush3.bf16.msra.mxu0 %v670_v8 }
  0x1d   : > { %675 = vmatprep.subr.bf16.mxu0 %v674_v13 }
  0x1f   : > { %629 = vmatmul.mubr.msk.f32.gmra.mrb[4].mxu0 %vm208_vm0, %v203_v20 }
  0x20   : > { %631 = vmatprep.mubr.msk.f32.mxu0 %vm208_vm0, %v204_v21  ;;  %677 = vmatpush3.bf16.msra.mxu0 %v674_v13 }
  0x21   : > { %679 = vmatprep.subr.bf16.mxu0 %v678_v18 }
  0x23   : > { %632 = vmatmul.mubr.msk.f32.gmra.mrb[6].mxu0 %vm208_vm0, %v205_v22 }
  0x24   : > { %681 = vmatpush3.bf16.msra.mxu0 %v678_v18 }
  0xea   : > { %v624_v23 = vpop.f32.mrb[0].mxu0 }
  0xeb   : > { %v299_v24 = vpop.f32.mrb[1].mxu0 }
  0xec   : > { %650 = vmatprep.mubr.msk.f32.mxu0 %vm346_vm1, %v299_v24 }
  0xed   : > { %651 = vmatmul.mubr.msk.f32.vlgmr.msra.gmra.mrb[8].mxu0 %vm346_vm1, %v624_v23 }
  0xee   : > { %v627_v25 = vpop.f32.mrb[2].mxu0 }
  0xef   : > { %v309_v26 = vpop.f32.mrb[3].mxu0 }
  0xf0   : > { %653 = vmatprep.mubr.msk.f32.mxu1 %vm346_vm1, %v309_v26 }
  0xf1   : > { %654 = vmatmul.mubr.msk.f32.vlgmr.msra.gmra.mrb[0].mxu1 %vm346_vm1, %v627_v25 }
  0xf2   : > { %v630_v27 = vpop.f32.mrb[4].mxu0 }
  0xf3   : > { %v319_v28 = vpop.f32.mrb[5].mxu0 }
  0xf4   : > { %656 = vmatprep.mubr.msk.f32.mxu1 %vm346_vm1, %v319_v28 }
  0xf5   : > { %657 = vmatmul.mubr.msk.f32.gmra.mrb[2].mxu1 %vm346_vm1, %v630_v27 }
  0xf6   : > { %v633_v29 = vpop.f32.mrb[6].mxu0 }
  0xf7   : > { %v329_v30 = vpop.f32.mrb[7].mxu0 }
  0xf8   : > { %659 = vmatprep.mubr.msk.f32.mxu1 %vm346_vm1, %v329_v30 }
  0xf9   : > { %660 = vmatmul.mubr.msk.f32.gmra.mrb[4].mxu1 %vm346_vm1, %v633_v29 }
 0x1c0   : > { %v652_v32 = vpop.f32.mrb[8].mxu0 }
 0x1c1   : > { %v484_v33 = vadd.f32 %v652_v32, %v587_v31  ;;  %v437_v34 = vpop.f32.mrb[9].mxu0 }
 0x1c2   : > { %v483_v35 = vadd.f32 %v587_v31, %v437_v34 }
 0x1c3   : > { %v492_v36 = vmax.f32 %v484_v33, 0.0 }
 0x1c4   : > { %v491_v37 = vmax.f32 %v483_v35, 0.0  ;;  %v655_v38 = vpop.f32.mrb[0].mxu1 }
 0x1c5   : > { %500 = vst [vmem:[%s197_s8 + $0x8] sm:$0xff] %v492_v36  ;;  %v486_v39 = vadd.f32 %v655_v38, %v587_v31  ;;  %v447_v40 = vpop.f32.mrb[1].mxu1 }
 0x1c6   : > { %499 = vst [vmem:[%s197_s8] sm:$0xff] %v491_v37  ;;  %v485_v41 = vadd.f32 %v587_v31, %v447_v40 }
 0x1c7   : > { %v494_v42 = vmax.f32 %v486_v39, 0.0 }
 0x1c8   : > { %v493_v43 = vmax.f32 %v485_v41, 0.0  ;;  %v658_v44 = vpop.f32.mrb[2].mxu1 }
 0x1c9   : > { %502 = vst [vmem:[%s197_s8 + $0x18] sm:$0xff] %v494_v42  ;;  %v488_v45 = vadd.f32 %v658_v44, %v587_v31  ;;  %v457_v46 = vpop.f32.mrb[3].mxu1 }
 0x1ca   : > { %501 = vst [vmem:[%s197_s8 + $0x10] sm:$0xff] %v493_v43  ;;  %v487_v47 = vadd.f32 %v587_v31, %v457_v46 }
 0x1cb   : > { %v496_v48 = vmax.f32 %v488_v45, 0.0 }
 0x1cc   : > { %v495_v49 = vmax.f32 %v487_v47, 0.0  ;;  %v661_v50 = vpop.f32.mrb[4].mxu1 }
 0x1cd   : > { %504 = vst [vmem:[%s197_s8 + $0x28] sm:$0xff] %v496_v48  ;;  %v490_v51 = vadd.f32 %v661_v50, %v587_v31  ;;  %v467_v52 = vpop.f32.mrb[5].mxu1 }
 0x1ce   : > { %503 = vst [vmem:[%s197_s8 + $0x20] sm:$0xff] %v495_v49  ;;  %v489_v53 = vadd.f32 %v587_v31, %v467_v52 }
 0x1cf   : > { %v498_v54 = vmax.f32 %v490_v51, 0.0 }
 0x1d0   : > { %v497_v55 = vmax.f32 %v489_v53, 0.0 }
 0x1d1   : > { %506 = vst [vmem:[%s197_s8 + $0x38] sm:$0xff] %v498_v54 }
 0x1d2   : > { %505 = vst [vmem:[%s197_s8 + $0x30] sm:$0xff] %v497_v55 }
 0x1d3 PF: > { %s14_s15 = sadd.s32 1, %s704_s15  }
 0x1d4   : > { %p11_p4 = scmp.ge.s32.totalorder %s14_s15, 4  }
 0x1d6   :  { %13 = sbr.rel (!%p11_p4) target bundleno = 1 (0x1), region = 66 }

</bundles_post_ra>
